<compile_context>
chip_gen: v7x
topology: tpu7x:2x2x1
jax: 0.10.0
libtpu: 0.0.40
codegen_flags: <defaults>
</compile_context>

<pallas_src>
import functools

import jax
import jax.numpy as jnp
from jax.experimental import pallas as pl
from jax.experimental.pallas import tpu as pltpu


def _round_up(x, m):
    return (x + m - 1) // m * m


# --------------------------------------------------------------------------
# Kernel
# --------------------------------------------------------------------------
def _single_gate_kernel(xe_ref, xl_ref, we_ref, wl_ref, b_ref, out_ref,
                        *scratch, k_valid, mask_k):
    """One (batch-tile, K-chunk) step of the fused SingleGate forward.

    pre  = x_ent @ W_e + x_lit @ W_l + bias        (TB, 2*E_pad)  f32 accum
    g    = tanh(pre[:, :E])                        (g | gate packed along N)
    gate = sigmoid(pre[:, E_pad:E_pad+E])   via 0.5*tanh(0.5*x)+0.5 (1 EUP op)
    out  = x_ent + gate * (g - x_ent)       == (1-gate)*x_ent + gate*g
    """
    e = out_ref.shape[-1]            # true emb_size
    e_pad = xe_ref.shape[-1]         # lane-padded emb_size (mult of 128)
    k = pl.program_id(1)
    nk = pl.num_programs(1)

    # Streamed x_lit chunk (cast to bf16 in-kernel; no wrapper cast pass).
    xl = xl_ref[...]
    if mask_k:
        # The K extent was rounded up to a multiple of the K chunk; the tail
        # columns of the last chunk are uninitialised (possibly NaN) -> zero
        # them so they contribute exactly 0 to the accumulation.
        col = jax.lax.broadcasted_iota(jnp.int32, xl.shape, 1) + k * xl.shape[-1]
        xl = jnp.where(col < k_valid, xl, 0)
    lit_part = jnp.dot(xl.astype(jnp.bfloat16), wl_ref[...],
                       preferred_element_type=jnp.float32)

    def ent_plus_bias():
        return (jnp.dot(xe_ref[...].astype(jnp.bfloat16), we_ref[...],
                        preferred_element_type=jnp.float32)
                + b_ref[...])

    def epilogue(pre):
        xe = xe_ref[:, :e]                                   # f32, real columns
        g = jnp.tanh(pre[:, :e])
        # sigmoid(x) == 0.5*tanh(0.5*x) + 0.5 : single EUP push per element.
        gate = 0.5 * jnp.tanh(0.5 * pre[:, e_pad:e_pad + e]) + 0.5
        out_ref[...] = (xe + gate * (g - xe)).astype(out_ref.dtype)

    if not scratch:
        # Resident-weight path (n_k == 1): no VMEM accumulator round-trip.
        epilogue(ent_plus_bias() + lit_part)
        return

    acc_ref = scratch[0]

    @pl.when(k == 0)
    def _init():
        acc_ref[...] = ent_plus_bias() + lit_part

    @pl.when(k > 0)
    def _accum():
        acc_ref[...] += lit_part

    @pl.when(k == nk - 1)
    def _finalize():
        epilogue(acc_ref[...])


# --------------------------------------------------------------------------
# Wrapper-side layout / tiling decisions (one-time, in prepare_fused_params)
# --------------------------------------------------------------------------
def _vmem_budget_bytes():
    cap = 64 << 20                      # safe fallback for any generation
    try:
        info = pltpu.get_tpu_info()
        cap = int(getattr(info, "vmem_capacity_bytes", 0) or cap)
    except Exception:
        pass
    # ~80% of per-core VMEM: ~51 MiB on v7x (64 MiB/TC), ~102 MiB on v5e/v6e,
    # leaving headroom for Mosaic internal scratch.
    return int(0.8 * cap)


def _choose_tiling(e_pad, n, le, out_bytes, budget, tb_cap, max_k_chunk):
    """Pick (tk, n_k, tb_max) so weights + streamed tiles fit the budget."""
    slack = 2 << 20

    def tb_for(tk, wl_bufs):
        fixed = (e_pad * n * 2            # W_e  (bf16, single buffer)
                 + wl_bufs * tk * n * 2   # W_l chunk(s) (bf16)
                 + n * 4                  # fused bias
                 + slack)
        per_row = (2 * e_pad * 4          # x_ent tile (f32, 2 buffers)
                   + 2 * tk * 4           # x_lit tile (<=f32, 2 buffers)
                   + 2 * e_pad * out_bytes  # out tile (2 buffers)
                   + 2 * n * 4            # acc scratch + pre temporary
                   + tk * 2 + e_pad * 2)  # bf16 casts
        avail = budget - fixed
        if avail <= 0:
            return 0
        return min((avail // per_row) // 16 * 16, tb_cap)

    # 1) Fully-resident W_l (no K split) if it still leaves a decent MXU tile.
    if max_k_chunk is None or max_k_chunk >= le:
        tb = tb_for(le, 1)
        if tb >= min(256, tb_cap):
            return le, 1, tb

    # 2) K-split: largest multiple-of-128 divisor of the padded K extent that
    #    still leaves a decent batch tile (keep M,N tiles big, per v7x review).
    le_pad = _round_up(le, 128)
    q = le_pad // 128
    for d in range(q, 0, -1):
        if q % d:
            continue
        tk = d * 128
        if max_k_chunk is not None and tk > max_k_chunk:
            continue
        tb = tb_for(tk, 2)
        if tb >= min(256, tb_cap) or d == 1:
            n_k = le_pad // tk
            if n_k == 1:                 # degenerate split -> use exact K
                return le, 1, max(tb, 16)
            return tk, n_k, max(tb, 16)
    return 128, pl.cdiv(le_pad, 128), 16     # unreachable fallback


def prepare_fused_params(params, emb_size, lit_size, *,
                         out_dtype=jnp.float32,
                         batch_tile_cap=1024,
                         max_k_chunk=None,
                         vmem_budget_bytes=None):
    """One-time layout plumbing: fuse g/gate weights, pad, bf16-cast, tile plan."""
    E, L = emb_size, lit_size
    LE = L * E
    E_pad = _round_up(E, 128)
    N = 2 * E_pad                              # fused output dim:  g | gate

    if vmem_budget_bytes is None:
        vmem_budget_bytes = _vmem_budget_bytes()
    out_bytes = 2 if out_dtype == jnp.bfloat16 else 4

    tk, n_k, tb_max = _choose_tiling(E_pad, N, LE, out_bytes,
                                     vmem_budget_bytes, batch_tile_cap,
                                     max_k_chunk)
    LE_pad = tk * n_k                          # == LE when not K-split

    # Fused weights: columns [0:E) -> g half, [E_pad:E_pad+E) -> gate half.
    w_e = jnp.zeros((E_pad, N), jnp.float32)
    w_e = w_e.at[:E, :E].set(params["wg_ent"])
    w_e = w_e.at[:E, E_pad:E_pad + E].set(params["w_gate_ent"])

    w_l = jnp.zeros((LE_pad, N), jnp.float32)  # zero K-pad rows (NaN-safe)
    w_l = w_l.at[:LE, :E].set(params["wg_lit"])
    w_l = w_l.at[:LE, E_pad:E_pad + E].set(params["w_gate_lit"])

    bias = jnp.zeros((1, N), jnp.float32)
    bias = bias.at[:, :E].set(jnp.reshape(params["b_g"], (1, E)))
    bias = bias.at[:, E_pad:E_pad + E].set(jnp.reshape(params["gate_bias"], (1, E)))

    return {
        "w_e": w_e.astype(jnp.bfloat16),
        "w_l": w_l.astype(jnp.bfloat16),
        "bias": bias,
        "emb_size": E,
        "lit_size": L,
        "le": LE,
        "tk": int(tk),
        "n_k": int(n_k),
        "tb_max": max(int(tb_max), 16),
        "out_dtype": out_dtype,
        "vmem_limit": int(vmem_budget_bytes),
    }


# --------------------------------------------------------------------------
# Forward
# --------------------------------------------------------------------------
def single_gate_forward(x_ent, x_lit, fused):
    E = fused["emb_size"]
    LE = fused["le"]
    tk, n_k = fused["tk"], fused["n_k"]
    out_dtype = fused["out_dtype"]
    w_e, w_l, bias = fused["w_e"], fused["w_l"], fused["bias"]
    E_pad, N = w_e.shape

    B = x_ent.shape[0]

    # Batch tile: VMEM-budget-derived, multiple of 16 (tiling constraint) or
    # exactly B; >=2 grid steps when B allows so the "parallel" axis can shard
    # across v7x's two TensorCores.
    TB = min(fused["tb_max"], _round_up(B, 16))
    if B >= 32:
        TB = min(TB, _round_up(pl.cdiv(B, 2), 16))
    if TB >= B:
        TB = B
    grid_b = pl.cdiv(B, TB)

    # x_ent (small): pad the K columns to E_pad (keeps MXU K and the epilogue
    # lane slices aligned); stays f32 for the epilogue numerics.
    xe = jnp.zeros((B, E_pad), jnp.float32)
    xe = xe.at[:, :E].set(x_ent.astype(jnp.float32))

    # x_lit (dominant stream): NO wrapper pad/cast pass — flatten (free) and
    # stream as-is; bf16 cast happens in-kernel.
    xl = x_lit.reshape(B, -1)
    if xl.dtype != jnp.float32 and xl.dtype != jnp.bfloat16:
        xl = xl.astype(jnp.float32)
    assert xl.shape[1] == LE

    mask_k = (tk * n_k) != LE                       # static: ragged K tail?
    kernel = functools.partial(_single_gate_kernel, k_valid=LE, mask_k=mask_k)

    grid = (grid_b, n_k)
    scratch = [pltpu.VMEM((TB, N), jnp.float32)] if n_k > 1 else []

    def resident_spec(shape, index_map, single):
        # Constant-index resident blocks: single-buffer to halve VMEM use.
        if single:
            return pl.BlockSpec(shape, index_map, pipeline_mode=pl.Buffered(1))
        return pl.BlockSpec(shape, index_map)

    def _call(single_buffer_weights):
        in_specs = [
            pl.BlockSpec((TB, E_pad), lambda i, k: (i, 0)),        # x_ent tile
            # x_lit K chunk (streamed; default double-buffered — sweep
            # pl.Buffered(3) here on v7x if DMA-exposed).
            pl.BlockSpec((TB, tk), lambda i, k: (i, k)),
            resident_spec((E_pad, N), lambda i, k: (0, 0),
                          single_buffer_weights),                   # W_e
            resident_spec((tk, N), lambda i, k: (k, 0),
                          single_buffer_weights and n_k == 1),      # W_l
            resident_spec((1, N), lambda i, k: (0, 0),
                          single_buffer_weights),                   # fused bias
        ]
        return pl.pallas_call(
            kernel,
            out_shape=jax.ShapeDtypeStruct((B, E), out_dtype),
            grid_spec=pltpu.PrefetchScalarGridSpec(
                num_scalar_prefetch=0,
                grid=grid,
                in_specs=in_specs,
                out_specs=pl.BlockSpec((TB, E), lambda i, k: (i, 0)),
                scratch_shapes=scratch,
            ),
            compiler_params=pltpu.CompilerParams(
                dimension_semantics=("parallel", "arbitrary"),
                vmem_limit_bytes=fused["vmem_limit"],
            ),
        )(xe, xl, w_e, w_l, bias)

    try:
        return _call(True)       # single-buffered resident weights
    except Exception:
        return _call(False)      # fallback: default double-buffering


# --------------------------------------------------------------------------
# Parameter init + pure-JAX reference (for the self-test)
# --------------------------------------------------------------------------
def init_params(key, emb_size, lit_size):
    """Deterministic synthetic init matching the PyTorch parameter shapes."""
    E, L = emb_size, lit_size
    k = jax.random.split(key, 5)
    fan_g = E + L * E
    bound_g = 1.0 / jnp.sqrt(fan_g)
    wg = jax.random.uniform(k[0], (fan_g, E), jnp.float32, -bound_g, bound_g)
    bg = jax.random.uniform(k[1], (1, E), jnp.float32, -bound_g, bound_g)
    bound_e = 1.0 / jnp.sqrt(E)
    w_gate_ent = jax.random.uniform(k[2], (E, E), jnp.float32, -bound_e, bound_e)
    bound_l = 1.0 / jnp.sqrt(L * E)
    w_gate_lit = jax.random.uniform(k[3], (L * E, E), jnp.float32, -bound_l, bound_l)
    gate_bias = jnp.zeros((1, E), jnp.float32)      # torch.zeros(emb_size)
    return {
        "wg_ent": wg[:E, :],
        "wg_lit": wg[E:, :],
        "b_g": bg,
        "w_gate_ent": w_gate_ent,
        "w_gate_lit": w_gate_lit,
        "gate_bias": gate_bias,
    }


def _reference(x_ent, x_lit, params):
    """Pure-JAX f32 reference of the PyTorch forward."""
    xe = x_ent.astype(jnp.float32)
    xl = x_lit.reshape(x_lit.shape[0], -1).astype(jnp.float32)
    g_emb = jnp.tanh(xe @ params["wg_ent"] + xl @ params["wg_lit"] + params["b_g"])
    gate = jax.nn.sigmoid(xe @ params["w_gate_ent"] + xl @ params["w_gate_lit"]
                          + params["gate_bias"])
    return (1.0 - gate) * xe + gate * g_emb


if __name__ == "__main__":
    key = jax.random.PRNGKey(0)
    k_p, k_e, k_l, k_p2, k_e2, k_l2 = jax.random.split(key, 6)

    # ---- Config 1: resident-weight path (no K split) -----------------------
    B, E, L = 8, 32, 4
    params = init_params(k_p, E, L)
    fused = prepare_fused_params(params, E, L)
    x_ent = jax.random.normal(k_e, (B, E), jnp.float32)
    x_lit = jax.random.normal(k_l, (B, L, E), jnp.float32)

    out = jax.block_until_ready(single_gate_forward(x_ent, x_lit, fused))
    ref = _reference(x_ent, x_lit, params)
    assert out.shape == (B, E) and out.dtype == jnp.float32
    # bf16 matmul operands (f32 accumulation) -> loose tolerance.
    assert jnp.allclose(out, ref, atol=2e-2, rtol=2e-2), (
        float(jnp.max(jnp.abs(out - ref))))

    # ---- Config 2: K-split + ragged-K masking path --------------------------
    # (Forced via max_k_chunk so the path is exercised at test size; in
    # production it triggers when W_l exceeds the per-generation VMEM budget.)
    B2, E2, L2 = 16, 24, 11                       # L2*E2 = 264 -> 3 chunks of 128
    params2 = init_params(k_p2, E2, L2)
    fused2 = prepare_fused_params(params2, E2, L2, max_k_chunk=128)
    x_ent2 = jax.random.normal(k_e2, (B2, E2), jnp.float32)
    x_lit2 = jax.random.normal(k_l2, (B2, L2, E2), jnp.float32)

    out2 = jax.block_until_ready(single_gate_forward(x_ent2, x_lit2, fused2))
    ref2 = _reference(x_ent2, x_lit2, params2)
    assert out2.shape == (B2, E2)
    assert jnp.allclose(out2, ref2, atol=2e-2, rtol=2e-2), (
        float(jnp.max(jnp.abs(out2 - ref2))))

    print("KERNEL_OK")
</pallas_src>

<mosaic_0001>
module attributes {stable_mosaic.version = 11 : i64} {
  func.func @_single_gate_kernel(%arg0: i32, %arg1: i32, %arg2: memref<8x128xf32, #tpu.memory_space<vmem>>, %arg3: memref<8x128xf32, #tpu.memory_space<vmem>>, %arg4: memref<128x256xbf16, #tpu.memory_space<vmem>>, %arg5: memref<128x256xbf16, #tpu.memory_space<vmem>>, %arg6: memref<1x256xf32, #tpu.memory_space<vmem>>, %arg7: memref<8x32xf32, #tpu.memory_space<vmem>>) attributes {dimension_semantics = [#tpu.dimension_semantics<parallel>, #tpu.dimension_semantics<arbitrary>], iteration_bounds = array<i64: 1, 1>, scalar_prefetch = 0 : i64, scratch_operands = 0 : i64, tpu.core_type = #tpu.core_type<tc>, window_params = [{transform_indices = @transform_0, window_bounds = array<i64: 8, 128>}, {transform_indices = @transform_1, window_bounds = array<i64: 8, 128>}, {pipeline_mode = #tpu.pipeline_mode<synchronous>, transform_indices = @transform_2, window_bounds = array<i64: 128, 256>}, {pipeline_mode = #tpu.pipeline_mode<synchronous>, transform_indices = @transform_3, window_bounds = array<i64: 128, 256>}, {pipeline_mode = #tpu.pipeline_mode<synchronous>, transform_indices = @transform_4, window_bounds = array<i64: 1, 256>}, {transform_indices = @transform_5, window_bounds = array<i64: 8, 32>}]} {
    %c0 = arith.constant 0 : index
    %c0_0 = arith.constant 0 : index
    %0 = vector.load %arg3[%c0, %c0_0] : memref<8x128xf32, #tpu.memory_space<vmem>>, vector<8x128xf32>
    %1 = arith.truncf %0 : vector<8x128xf32> to vector<8x128xbf16>
    %c0_1 = arith.constant 0 : index
    %c0_2 = arith.constant 0 : index
    %2 = vector.load %arg5[%c0_1, %c0_2] : memref<128x256xbf16, #tpu.memory_space<vmem>>, vector<128x256xbf16>
    %cst = arith.constant dense<0.000000e+00> : vector<8x256xf32>
    %3 = tpu.matmul %1, %2, %cst {dimension_numbers = #tpu.dot_dimension_numbers<[1], [0], [0], [1], [0, 0, 1, 1], [], []>} : vector<8x128xbf16>, vector<128x256xbf16>, vector<8x256xf32> -> vector<8x256xf32>
    %c0_3 = arith.constant 0 : index
    %c0_4 = arith.constant 0 : index
    %4 = vector.load %arg2[%c0_3, %c0_4] : memref<8x128xf32, #tpu.memory_space<vmem>>, vector<8x128xf32>
    %5 = arith.truncf %4 : vector<8x128xf32> to vector<8x128xbf16>
    %c0_5 = arith.constant 0 : index
    %c0_6 = arith.constant 0 : index
    %6 = vector.load %arg4[%c0_5, %c0_6] : memref<128x256xbf16, #tpu.memory_space<vmem>>, vector<128x256xbf16>
    %cst_7 = arith.constant dense<0.000000e+00> : vector<8x256xf32>
    %7 = tpu.matmul %5, %6, %cst_7 {dimension_numbers = #tpu.dot_dimension_numbers<[1], [0], [0], [1], [0, 0, 1, 1], [], []>} : vector<8x128xbf16>, vector<128x256xbf16>, vector<8x256xf32> -> vector<8x256xf32>
    %c0_8 = arith.constant 0 : index
    %c0_9 = arith.constant 0 : index
    %8 = vector.load %arg6[%c0_8, %c0_9] : memref<1x256xf32, #tpu.memory_space<vmem>>, vector<1x256xf32>
    %9 = vector.broadcast %8 : vector<1x256xf32> to vector<8x256xf32>
    %10 = arith.addf %7, %9 : vector<8x256xf32>
    %11 = arith.addf %10, %3 : vector<8x256xf32>
    %c0_10 = arith.constant 0 : index
    %c0_11 = arith.constant 0 : index
    %12 = vector.load %arg2[%c0_10, %c0_11] : memref<8x128xf32, #tpu.memory_space<vmem>>, vector<8x32xf32>
    %13 = vector.extract_strided_slice %11 {offsets = [0, 0], sizes = [8, 32], strides = [1, 1]} : vector<8x256xf32> to vector<8x32xf32>
    %14 = math.tanh %13 : vector<8x32xf32>
    %15 = vector.extract_strided_slice %11 {offsets = [0, 128], sizes = [8, 32], strides = [1, 1]} : vector<8x256xf32> to vector<8x32xf32>
    %cst_12 = arith.constant 5.000000e-01 : f32
    %16 = vector.broadcast %cst_12 : f32 to vector<8x32xf32>
    %17 = arith.mulf %16, %15 : vector<8x32xf32>
    %18 = math.tanh %17 : vector<8x32xf32>
    %cst_13 = arith.constant 5.000000e-01 : f32
    %19 = vector.broadcast %cst_13 : f32 to vector<8x32xf32>
    %20 = arith.mulf %19, %18 : vector<8x32xf32>
    %cst_14 = arith.constant 5.000000e-01 : f32
    %21 = vector.broadcast %cst_14 : f32 to vector<8x32xf32>
    %22 = arith.addf %20, %21 : vector<8x32xf32>
    %23 = arith.subf %14, %12 : vector<8x32xf32>
    %24 = arith.mulf %22, %23 : vector<8x32xf32>
    %25 = arith.addf %12, %24 : vector<8x32xf32>
    %c0_15 = arith.constant 0 : index
    %c0_16 = arith.constant 0 : index
    %26 = vector.load %arg7[%c0_15, %c0_16] : memref<8x32xf32, #tpu.memory_space<vmem>>, vector<8x32xf32>
    tpu.vector_store %arg7[%c0_15, %c0_16], %25 {strides = array<i32>} : memref<8x32xf32, #tpu.memory_space<vmem>>, vector<8x32xf32>,
    return
  }
  func.func @transform_0(%arg0: i32, %arg1: i32) -> (i32, i32) {
    %c0_i32 = arith.constant 0 : i32
    %c0_i32_0 = arith.constant 0 : i32
    return %arg0, %c0_i32 : i32, i32
  }
  func.func @transform_1(%arg0: i32, %arg1: i32) -> (i32, i32) {
    %c0_i32 = arith.constant 0 : i32
    return %arg0, %arg1 : i32, i32
  }
  func.func @transform_2(%arg0: i32, %arg1: i32) -> (i32, i32) {
    %c0_i32 = arith.constant 0 : i32
    %c0_i32_0 = arith.constant 0 : i32
    %c0_i32_1 = arith.constant 0 : i32
    return %c0_i32, %c0_i32_0 : i32, i32
  }
  func.func @transform_3(%arg0: i32, %arg1: i32) -> (i32, i32) {
    %c0_i32 = arith.constant 0 : i32
    %c0_i32_0 = arith.constant 0 : i32
    return %arg1, %c0_i32 : i32, i32
  }
  func.func @transform_4(%arg0: i32, %arg1: i32) -> (i32, i32) {
    %c0_i32 = arith.constant 0 : i32
    %c0_i32_0 = arith.constant 0 : i32
    %c0_i32_1 = arith.constant 0 : i32
    return %c0_i32, %c0_i32_0 : i32, i32
  }
  func.func @transform_5(%arg0: i32, %arg1: i32) -> (i32, i32) {
    %c0_i32 = arith.constant 0 : i32
    %c0_i32_0 = arith.constant 0 : i32
    return %arg0, %c0_i32 : i32, i32
  }
}

module attributes {stable_mosaic.version = 11 : i64} {
  func.func @_single_gate_kernel(%arg0: i32, %arg1: i32, %arg2: memref<8x128xf32, #tpu.memory_space<vmem>>, %arg3: memref<8x128xf32, #tpu.memory_space<vmem>>, %arg4: memref<128x256xbf16, #tpu.memory_space<vmem>>, %arg5: memref<128x256xbf16, #tpu.memory_space<vmem>>, %arg6: memref<1x256xf32, #tpu.memory_space<vmem>>, %arg7: memref<8x32xf32, #tpu.memory_space<vmem>>) attributes {dimension_semantics = [#tpu.dimension_semantics<parallel>, #tpu.dimension_semantics<arbitrary>], iteration_bounds = array<i64: 1, 1>, scalar_prefetch = 0 : i64, scratch_operands = 0 : i64, tpu.core_type = #tpu.core_type<tc>, window_params = [{transform_indices = @transform_0, window_bounds = array<i64: 8, 128>}, {transform_indices = @transform_1, window_bounds = array<i64: 8, 128>}, {pipeline_mode = #tpu.pipeline_mode<synchronous>, transform_indices = @transform_2, window_bounds = array<i64: 128, 256>}, {transform_indices = @transform_3, window_bounds = array<i64: 128, 256>}, {pipeline_mode = #tpu.pipeline_mode<synchronous>, transform_indices = @transform_4, window_bounds = array<i64: 1, 256>}, {transform_indices = @transform_5, window_bounds = array<i64: 8, 32>}]} {
    %c0 = arith.constant 0 : index
    %c0_0 = arith.constant 0 : index
    %0 = vector.load %arg3[%c0, %c0_0] : memref<8x128xf32, #tpu.memory_space<vmem>>, vector<8x128xf32>
    %1 = arith.truncf %0 : vector<8x128xf32> to vector<8x128xbf16>
    %c0_1 = arith.constant 0 : index
    %c0_2 = arith.constant 0 : index
    %2 = vector.load %arg5[%c0_1, %c0_2] : memref<128x256xbf16, #tpu.memory_space<vmem>>, vector<128x256xbf16>
    %cst = arith.constant dense<0.000000e+00> : vector<8x256xf32>
    %3 = tpu.matmul %1, %2, %cst {dimension_numbers = #tpu.dot_dimension_numbers<[1], [0], [0], [1], [0, 0, 1, 1], [], []>} : vector<8x128xbf16>, vector<128x256xbf16>, vector<8x256xf32> -> vector<8x256xf32>
    %c0_3 = arith.constant 0 : index
    %c0_4 = arith.constant 0 : index
    %4 = vector.load %arg2[%c0_3, %c0_4] : memref<8x128xf32, #tpu.memory_space<vmem>>, vector<8x128xf32>
    %5 = arith.truncf %4 : vector<8x128xf32> to vector<8x128xbf16>
    %c0_5 = arith.constant 0 : index
    %c0_6 = arith.constant 0 : index
    %6 = vector.load %arg4[%c0_5, %c0_6] : memref<128x256xbf16, #tpu.memory_space<vmem>>, vector<128x256xbf16>
    %cst_7 = arith.constant dense<0.000000e+00> : vector<8x256xf32>
    %7 = tpu.matmul %5, %6, %cst_7 {dimension_numbers = #tpu.dot_dimension_numbers<[1], [0], [0], [1], [0, 0, 1, 1], [], []>} : vector<8x128xbf16>, vector<128x256xbf16>, vector<8x256xf32> -> vector<8x256xf32>
    %c0_8 = arith.constant 0 : index
    %c0_9 = arith.constant 0 : index
    %8 = vector.load %arg6[%c0_8, %c0_9] : memref<1x256xf32, #tpu.memory_space<vmem>>, vector<1x256xf32>
    %9 = vector.broadcast %8 : vector<1x256xf32> to vector<8x256xf32>
    %10 = arith.addf %7, %9 : vector<8x256xf32>
    %11 = arith.addf %10, %3 : vector<8x256xf32>
    %c0_10 = arith.constant 0 : index
    %c0_11 = arith.constant 0 : index
    %12 = vector.load %arg2[%c0_10, %c0_11] : memref<8x128xf32, #tpu.memory_space<vmem>>, vector<8x32xf32>
    %13 = vector.extract_strided_slice %11 {offsets = [0, 0], sizes = [8, 32], strides = [1, 1]} : vector<8x256xf32> to vector<8x32xf32>
    %14 = math.tanh %13 : vector<8x32xf32>
    %15 = vector.extract_strided_slice %11 {offsets = [0, 128], sizes = [8, 32], strides = [1, 1]} : vector<8x256xf32> to vector<8x32xf32>
    %cst_12 = arith.constant 5.000000e-01 : f32
    %16 = vector.broadcast %cst_12 : f32 to vector<8x32xf32>
    %17 = arith.mulf %16, %15 : vector<8x32xf32>
    %18 = math.tanh %17 : vector<8x32xf32>
    %cst_13 = arith.constant 5.000000e-01 : f32
    %19 = vector.broadcast %cst_13 : f32 to vector<8x32xf32>
    %20 = arith.mulf %19, %18 : vector<8x32xf32>
    %cst_14 = arith.constant 5.000000e-01 : f32
    %21 = vector.broadcast %cst_14 : f32 to vector<8x32xf32>
    %22 = arith.addf %20, %21 : vector<8x32xf32>
    %23 = arith.subf %14, %12 : vector<8x32xf32>
    %24 = arith.mulf %22, %23 : vector<8x32xf32>
    %25 = arith.addf %12, %24 : vector<8x32xf32>
    %c0_15 = arith.constant 0 : index
    %c0_16 = arith.constant 0 : index
    %26 = vector.load %arg7[%c0_15, %c0_16] : memref<8x32xf32, #tpu.memory_space<vmem>>, vector<8x32xf32>
    tpu.vector_store %arg7[%c0_15, %c0_16], %25 {strides = array<i32>} : memref<8x32xf32, #tpu.memory_space<vmem>>, vector<8x32xf32>,
    return
  }
  func.func @transform_0(%arg0: i32, %arg1: i32) -> (i32, i32) {
    %c0_i32 = arith.constant 0 : i32
    %c0_i32_0 = arith.constant 0 : i32
    return %arg0, %c0_i32 : i32, i32
  }
  func.func @transform_1(%arg0: i32, %arg1: i32) -> (i32, i32) {
    %c0_i32 = arith.constant 0 : i32
    return %arg0, %arg1 : i32, i32
  }
  func.func @transform_2(%arg0: i32, %arg1: i32) -> (i32, i32) {
    %c0_i32 = arith.constant 0 : i32
    %c0_i32_0 = arith.constant 0 : i32
    %c0_i32_1 = arith.constant 0 : i32
    return %c0_i32, %c0_i32_0 : i32, i32
  }
  func.func @transform_3(%arg0: i32, %arg1: i32) -> (i32, i32) {
    %c0_i32 = arith.constant 0 : i32
    %c0_i32_0 = arith.constant 0 : i32
    return %arg1, %c0_i32 : i32, i32
  }
  func.func @transform_4(%arg0: i32, %arg1: i32) -> (i32, i32) {
    %c0_i32 = arith.constant 0 : i32
    %c0_i32_0 = arith.constant 0 : i32
    %c0_i32_1 = arith.constant 0 : i32
    return %c0_i32, %c0_i32_0 : i32, i32
  }
  func.func @transform_5(%arg0: i32, %arg1: i32) -> (i32, i32) {
    %c0_i32 = arith.constant 0 : i32
    %c0_i32_0 = arith.constant 0 : i32
    return %arg0, %c0_i32 : i32, i32
  }
}

</mosaic_0001>

<bundles_post_ra>
// kernel: tpu_custom_call.1
= control target key start
LH: loop header
LB: loop body
LE: loop exit
PB: predicated region body
PF: predicated region fallthrough
CT: control target
= control target key end

     0   :  { %10 = vsyncpa [#allocation3], 0  ;;  %s707_s0 = inlined_call_operand.hbm [shape: f32[8,128], index: 0, kind: input, shape index: {}]   ;;  %s708_s1 = inlined_call_operand.hbm [shape: f32[8,128], index: 1, kind: input, shape index: {}]   ;;  %s709_s2 = inlined_call_operand.hbm [shape: bf16[128,256], index: 2, kind: input, shape index: {}]   ;;  %s710_s3 = inlined_call_operand.hbm [shape: bf16[128,256], index: 3, kind: input, shape index: {}]   ;;  %s711_s4 = inlined_call_operand.vmem [shape: f32[1,256], index: 4, kind: input, shape index: {}]   ;;  %s712_s5 = inlined_call_operand.hbm [shape: f32[8,32], index: 5, kind: output, shape index: {}]  }
   0x1   :  { %11 = vsyncpa [#allocation6], 0 }
   0x2   :  { %12 = vsyncpa [#allocation9], 0 }
   0x3   :  { %13 = vsyncpa [#allocation4], 0  ;;  %s606_s18 = smov [#allocation5]   ;;  %s607_s20 = smov [#allocation2]  }
   0x4   :  { %s30_s19 = sshll.u32 %s606_s18, 4  ;;  %s20_s21 = sshll.u32 %s607_s20, 4  ;;  %s31_s19 = int_to_ptr.vmem [resolvable:$true] %s30_s19  ;;  %s21_s21 = int_to_ptr.vmem [resolvable:$true] %s20_s21 }
   0x5   :  { %s488_s24 = scalar_lea.hbm %s708_s1, 128 }
   0x6   :  { %p489_p0 = scmp.ne.s32.totalorder %s708_s1, %s488_s24  ;;  %p492_p1 = scmp.lt.u32.totalorder %s488_s24, %s708_s1 }
   0x8   :  { %p494_p2 = pnand %p492_p1, %p489_p0 }
   0xa   :  { %497 = shalt.err (!%p494_p2)
}
   0xb   :  { %s498_s29 = scalar_lea.vmem %s31_s19, 128  ;;  %p503_p4 = scmp.lt.s32.totalorder %s31_s19, %s31_s19 }
   0xc   :  { %p499_p3 = scmp.ne.s32.totalorder %s31_s19, %s498_s29  ;;  %p504_p5 = scmp.lt.s32.totalorder %s498_s29, %s498_s29 }
   0xe   :  { %p505_p6 = por %p504_p5, %p503_p4 }
  0x10   :  { %p506_p7 = pnand %p505_p6, %p499_p3 }
  0x12   :  { %509 = shalt.err (!%p506_p7)
}
  0x13   :  { %33 = dma.hbm_to_vmem [thread:$0]  %s708_s1, 128, %s31_s19, [#allocation6]  }
  0x14   :  { %s510_s9 = scalar_lea.hbm %s707_s0, 128 }
  0x15   :  { %p511_p8 = scmp.ne.s32.totalorder %s707_s0, %s510_s9  ;;  %p514_p9 = scmp.lt.u32.totalorder %s510_s9, %s707_s0 }
  0x17   :  { %p516_p10 = pnand %p514_p9, %p511_p8 }
  0x19   :  { %519 = shalt.err (!%p516_p10)
}
  0x1a   :  { %s520_s14 = scalar_lea.vmem %s21_s21, 128  ;;  %p525_p12 = scmp.lt.s32.totalorder %s21_s21, %s21_s21 }
  0x1b   :  { %p521_p11 = scmp.ne.s32.totalorder %s21_s21, %s520_s14  ;;  %p526_p13 = scmp.lt.s32.totalorder %s520_s14, %s520_s14 }
  0x1d   :  { %p527_p0 = por %p526_p13, %p525_p12 }
  0x1f   :  { %p528_p1 = pnand %p527_p0, %p521_p11 }
  0x21   :  { %531 = shalt.err (!%p528_p1)
}
  0x22   :  { %23 = dma.hbm_to_vmem [thread:$0]  %s707_s0, 128, %s21_s21, [#allocation3]  }
  0x23   :  { %s608_s16 = smov [#allocation7]   ;;  %s532_s20 = scalar_lea.hbm %s709_s2, 2048 }
  0x24   :  { %s39_s17 = sshll.u32 %s608_s16, 4  ;;  %p533_p2 = scmp.ne.s32.totalorder %s709_s2, %s532_s20  ;;  %s40_s17 = int_to_ptr.vmem [resolvable:$true] %s39_s17 }
  0x25   :  { %p536_p3 = scmp.lt.u32.totalorder %s532_s20, %s709_s2 }
  0x27   :  { %p538_p4 = pnand %p536_p3, %p533_p2 }
  0x29   :  { %541 = shalt.err (!%p538_p4)
}
  0x2a   :  { %s542_s26 = scalar_lea.vmem %s40_s17, 2048  ;;  %p547_p6 = scmp.lt.s32.totalorder %s40_s17, %s40_s17 }
  0x2b   :  { %p543_p5 = scmp.ne.s32.totalorder %s40_s17, %s542_s26  ;;  %p548_p7 = scmp.lt.s32.totalorder %s542_s26, %s542_s26 }
  0x2d   :  { %p549_p8 = por %p548_p7, %p547_p6 }
  0x2f   :  { %p550_p9 = pnand %p549_p8, %p543_p5 }
  0x31   :  { %553 = shalt.err (!%p550_p9)
}
  0x32   :  { %s609_s0 = smov 128   ;;  %s610_s21 = smov 8  }
  0x33   :  { %45 = dma.hbm_to_vmem [thread:$0]  %s709_s2, 2048, %s40_s17, [#allocation6], %s609_s0, %s609_s0, %s610_s21  }
  0x34   :  { %s611_s29 = smov [#allocation8]   ;;  %s554_s8 = scalar_lea.hbm %s710_s3, 2048 }
  0x35   :  { %s51_s30 = sshll.u32 %s611_s29, 4  ;;  %p555_p10 = scmp.ne.s32.totalorder %s710_s3, %s554_s8  ;;  %s52_s30 = int_to_ptr.vmem [resolvable:$true] %s51_s30 }
  0x36   :  { %p558_p11 = scmp.lt.u32.totalorder %s554_s8, %s710_s3 }
  0x38   :  { %p560_p12 = pnand %p558_p11, %p555_p10 }
  0x3a   :  { %563 = shalt.err (!%p560_p12)
}
  0x3b   :  { %s564_s13 = scalar_lea.vmem %s52_s30, 2048  ;;  %p569_p0 = scmp.lt.s32.totalorder %s52_s30, %s52_s30 }
  0x3c   :  { %p565_p13 = scmp.ne.s32.totalorder %s52_s30, %s564_s13  ;;  %p570_p1 = scmp.lt.s32.totalorder %s564_s13, %s564_s13 }
  0x3e   :  { %p571_p2 = por %p570_p1, %p569_p0 }
  0x40   :  { %p572_p3 = pnand %p571_p2, %p565_p13 }
  0x42   :  { %575 = shalt.err (!%p572_p3)
}
  0x43   :  { %57 = dma.hbm_to_vmem [thread:$0]  %s710_s3, 2048, %s52_s30, [#allocation9], %s609_s0, %s609_s0, %s610_s21  }
  0x44   :  { %598 = dma.done.wait [#allocation3], 128  }
  0x45   :  { %599 = vsyncadd [#allocation3], 4294967168 }
  0x46   :  { %600 = dma.done.wait [#allocation6], 2176  }
  0x47   :  { %601 = vsyncadd [#allocation6], 4294965120 }
  0x48   :  { %602 = dma.done.wait [#allocation9], 2048  }
  0x49   :  { %603 = vsyncadd [#allocation9], 4294965248  ;;  %v612_v0 = vmov 0   ;;  %v436_v1 = vld [vmem:[#allocation8 + $0x4] ss:$8 sps:$4 sm:$0xff]   ;;  %v73_v33 = vld [vmem:[#allocation5] sm:$0xff]  ;;  %v232_v37 = vlaneseq }
  0x4a   :  { %203 = vmatprep.mubr.bf16.mxu1 %v612_v0  ;;  %354 = vmatprep.mubr.bf16.mxu0 %v612_v0  ;;  %v438_v2 = vld [vmem:[#allocation7 + $0x4] ss:$8 sps:$4 sm:$0xff]   ;;  %v440_v3 = vld [vmem:[#allocation8] ss:$8 sps:$4 sm:$0xff]   ;;  %v442_v5 = vld [vmem:[#allocation8 + $0x14] ss:$8 sps:$4 sm:$0xff]   ;;  %v74_v35 = vpack.c.bf16 %v73_v33, %v73_v33 }
  0x4b   :  { %171 = vmatprep.subr.bf16.mxu1 %v436_v1  ;;  %v441_v4 = vld [vmem:[#allocation7] ss:$8 sps:$4 sm:$0xff]   ;;  %322 = vmatprep.subr.bf16.mxu0 %v438_v2  ;;  %v444_v6 = vld [vmem:[#allocation7 + $0x14] ss:$8 sps:$4 sm:$0xff]   ;;  %v446_v7 = vld [vmem:[#allocation8 + $0x10] ss:$8 sps:$4 sm:$0xff]  }
  0x4c   :  { %172 = vmatpush1.bf16.msra.mxu1 %v440_v3  ;;  %323 = vmatpush1.bf16.msra.mxu0 %v441_v4  ;;  %v447_v8 = vld [vmem:[#allocation7 + $0x10] ss:$8 sps:$4 sm:$0xff]   ;;  %v448_v9 = vld [vmem:[#allocation8 + $0x24] ss:$8 sps:$4 sm:$0xff]   ;;  %v452_v11 = vld [vmem:[#allocation8 + $0x20] ss:$8 sps:$4 sm:$0xff]  }
  0x4d   :  { %173 = vmatprep.subr.bf16.mxu1 %v442_v5  ;;  %324 = vmatprep.subr.bf16.mxu0 %v444_v6  ;;  %v450_v10 = vld [vmem:[#allocation7 + $0x24] ss:$8 sps:$4 sm:$0xff]   ;;  %v453_v12 = vld [vmem:[#allocation7 + $0x20] ss:$8 sps:$4 sm:$0xff]   ;;  %v454_v13 = vld [vmem:[#allocation8 + $0x34] ss:$8 sps:$4 sm:$0xff]  }
  0x4e   :  { %v456_v14 = vld [vmem:[#allocation7 + $0x34] ss:$8 sps:$4 sm:$0xff]   ;;  %v458_v15 = vld [vmem:[#allocation8 + $0x30] ss:$8 sps:$4 sm:$0xff]   ;;  %v460_v17 = vld [vmem:[#allocation8 + $0x44] ss:$8 sps:$4 sm:$0xff]  }
  0x4f   :  { %v459_v16 = vld [vmem:[#allocation7 + $0x30] ss:$8 sps:$4 sm:$0xff]   ;;  %v462_v18 = vld [vmem:[#allocation7 + $0x44] ss:$8 sps:$4 sm:$0xff]   ;;  %v464_v19 = vld [vmem:[#allocation8 + $0x40] ss:$8 sps:$4 sm:$0xff]  }
  0x50   :  { %174 = vmatpush1.bf16.msra.mxu1 %v446_v7  ;;  %325 = vmatpush1.bf16.msra.mxu0 %v447_v8  ;;  %v465_v20 = vld [vmem:[#allocation7 + $0x40] ss:$8 sps:$4 sm:$0xff]   ;;  %v466_v21 = vld [vmem:[#allocation8 + $0x54] ss:$8 sps:$4 sm:$0xff]   ;;  %v470_v23 = vld [vmem:[#allocation8 + $0x50] ss:$8 sps:$4 sm:$0xff]  }
  0x51   :  { %175 = vmatprep.subr.bf16.mxu1 %v448_v9  ;;  %326 = vmatprep.subr.bf16.mxu0 %v450_v10  ;;  %v468_v22 = vld [vmem:[#allocation7 + $0x54] ss:$8 sps:$4 sm:$0xff]   ;;  %v471_v24 = vld [vmem:[#allocation7 + $0x50] ss:$8 sps:$4 sm:$0xff]   ;;  %v472_v25 = vld [vmem:[#allocation8 + $0x64] ss:$8 sps:$4 sm:$0xff]  }
  0x52   :  { %v474_v26 = vld [vmem:[#allocation7 + $0x64] ss:$8 sps:$4 sm:$0xff]   ;;  %v476_v27 = vld [vmem:[#allocation8 + $0x60] ss:$8 sps:$4 sm:$0xff]   ;;  %v478_v29 = vld [vmem:[#allocation8 + $0x74] ss:$8 sps:$4 sm:$0xff]  }
  0x53   :  { %v477_v28 = vld [vmem:[#allocation7 + $0x60] ss:$8 sps:$4 sm:$0xff]   ;;  %v480_v30 = vld [vmem:[#allocation7 + $0x74] ss:$8 sps:$4 sm:$0xff]   ;;  %v482_v31 = vld [vmem:[#allocation8 + $0x70] ss:$8 sps:$4 sm:$0xff]  }
  0x54   :  { %176 = vmatpush1.bf16.msra.mxu1 %v452_v11  ;;  %327 = vmatpush1.bf16.msra.mxu0 %v453_v12  ;;  %v483_v32 = vld [vmem:[#allocation7 + $0x70] ss:$8 sps:$4 sm:$0xff]   ;;  %v233_v38 = vshrl.u32 %v232_v37, 7  ;;  %vm373_vm0 = vcmask 261120  }
  0x55   :  { %177 = vmatprep.subr.bf16.mxu1 %v454_v13  ;;  %328 = vmatprep.subr.bf16.mxu0 %v456_v14  ;;  %v212_v34 = vld [vmem:[#allocation2] sm:$0xff] }
  0x56   :  { %v213_v36 = vpack.c.bf16 %v212_v34, %v212_v34  ;;  %v234_v39 = vsub.s32 0, %v233_v38  ;;  %v230_v40 = vld [vmem:[%s711_s4] sm:$0x3]  ;;  %v238_v41 = vsub.s32 1, %v233_v38  ;;  %s613_s4 = smov [#allocation10]  }
  0x57   :  { %s381_s15 = sshll.u32 %s613_s4, 4  ;;  %s382_s15 = int_to_ptr.vmem [resolvable:$true] %s381_s15 }
  0x58   :  { %178 = vmatpush1.bf16.msra.mxu1 %v458_v15  ;;  %329 = vmatpush1.bf16.msra.mxu0 %v459_v16  ;;  %v235_v42 = vrot.slane %v230_v40, %v234_v39  ;;  %v239_v43 = vrot.slane %v230_v40, %v238_v41  ;;  %s576_s16 = scalar_lea.vmem %s382_s15, 128  ;;  %p581_p5 = scmp.lt.s32.totalorder %s382_s15, %s382_s15 }
  0x59   :  { %179 = vmatprep.subr.bf16.mxu1 %v460_v17  ;;  %330 = vmatprep.subr.bf16.mxu0 %v462_v18  ;;  %p577_p4 = scmp.ne.s32.totalorder %s382_s15, %s576_s16  ;;  %p582_p6 = scmp.lt.s32.totalorder %s576_s16, %s576_s16 }
  0x5b   :  { %p583_p7 = por %p582_p6, %p581_p5 }
  0x5c   :  { %180 = vmatpush1.bf16.msra.mxu1 %v464_v19  ;;  %331 = vmatpush1.bf16.msra.mxu0 %v465_v20 }
  0x5d   :  { %181 = vmatprep.subr.bf16.mxu1 %v466_v21  ;;  %332 = vmatprep.subr.bf16.mxu0 %v468_v22  ;;  %p584_p8 = pnand %p583_p7, %p577_p4 }
  0x60   :  { %182 = vmatpush1.bf16.msra.mxu1 %v470_v23  ;;  %333 = vmatpush1.bf16.msra.mxu0 %v471_v24 }
  0x61   :  { %183 = vmatprep.subr.bf16.mxu1 %v472_v25  ;;  %334 = vmatprep.subr.bf16.mxu0 %v474_v26 }
  0x64   :  { %184 = vmatpush1.bf16.msra.mxu1 %v476_v27  ;;  %335 = vmatpush1.bf16.msra.mxu0 %v477_v28 }
  0x65   :  { %185 = vmatprep.subr.bf16.mxu1 %v478_v29  ;;  %336 = vmatprep.subr.bf16.mxu0 %v480_v30 }
  0x68   :  { %186 = vmatpush1.bf16.msra.mxu1 %v482_v31  ;;  %337 = vmatpush1.bf16.msra.mxu0 %v483_v32 }
  0x6b   :  { %204 = vmatmul.mubr.bf16.vlgmr.msra.gmra.mrb[0].mxu1 %v74_v35  ;;  %355 = vmatmul.mubr.bf16.vlgmr.msra.gmra.mrb[0].mxu0 %v213_v36 }
 0x13e   :  { %v205_v44 = vpop.f32.mrb[0].mxu1  ;;  %v356_v45 = vpop.f32.mrb[0].mxu0 }
 0x13f   :  { %v424_v46 = vadd.f32 %v235_v42, %v205_v44  ;;  %v207_v47 = vpop.f32.mrb[1].mxu1  ;;  %v358_v48 = vpop.f32.mrb[1].mxu0 }
 0x140   :  { %v426_v49 = vadd.f32 %v239_v43, %v207_v47  ;;  %v209_v50 = vpop.f32.mrb[2].mxu1  ;;  %v360_v51 = vpop.f32.mrb[2].mxu0 }
 0x141   :  { %v425_v52 = vadd.f32 %v424_v46, %v356_v45  ;;  %v210_v53 = vpop.f32.mrb[3].mxu1  ;;  %v361_v54 = vpop.f32.mrb[3].mxu0 }
 0x142   :  { %v427_v55 = vadd.f32 %v426_v49, %v358_v48 }
 0x143   :  { %484 = vtanh.f32 %v425_v52 }
 0x144   :  { %v366_v56 = vmul.f32 0.5, %v427_v55 }
 0x146   :  { %486 = vtanh.f32 %v366_v56 }
 0x14d   :  { %v485_v57 = vpop.eup %484 }
 0x14e   :  { %v370_v61 = vsub.f32 %v485_v57, %v212_v34 }
 0x150   :  { %v487_v58 = vpop.eup %486 }
 0x151   :  { %v368_v59 = vmul.f32 0.5, %v487_v58 }
 0x153   :  { %v369_v60 = vadd.f32 0.5, %v368_v59 }
 0x155   :  { %v371_v62 = vmul.f32 %v370_v61, %v369_v60 }
 0x157   :  { %v372_v63 = vadd.f32 %v371_v62, %v212_v34 }
 0x159   :  { %374 = vst.msk [vmem:[#allocation10] sm:$0xff] %vm373_vm0, %v372_v63 }
 0x15a   :  { %587 = shalt.err (!%p584_p8)
}
 0x15b   :  { %s588_s19 = scalar_lea.hbm %s712_s5, 128 }
 0x15c   :  { %p589_p9 = scmp.ne.s32.totalorder %s712_s5, %s588_s19  ;;  %p592_p10 = scmp.lt.u32.totalorder %s588_s19, %s712_s5 }
 0x15e   :  { %p594_p11 = pnand %p592_p10, %p589_p9 }
 0x160   :  { %597 = shalt.err (!%p594_p11)
}
 0x161   :  { %384 = dma.vmem_to_hbm [thread:$0]  %s382_s15, 128, %s712_s5, [#allocation4]  }
 0x162   :  { %604 = dma.done.wait [#allocation4], 128  }
 0x163   :  { %605 = vsyncadd [#allocation4], 4294967168 }
 0x164   :  { %388 = vsyncpa [#allocation3], 1 }
 0x165   :  { %389 = vsyncpa [#allocation6], 1 }
 0x166   :  { %390 = vsyncpa [#allocation9], 1 }
 0x167   :  { %391 = vsyncpa [#allocation4], 1 }

// kernel: tpu_custom_call.1
= control target key start
LH: loop header
LB: loop body
LE: loop exit
PB: predicated region body
PF: predicated region fallthrough
CT: control target
= control target key end

     0   :  { %10 = vsyncpa [#allocation3], 0  ;;  %s707_s0 = inlined_call_operand.hbm [shape: f32[8,128], index: 0, kind: input, shape index: {}]   ;;  %s708_s1 = inlined_call_operand.hbm [shape: f32[8,128], index: 1, kind: input, shape index: {}]   ;;  %s709_s2 = inlined_call_operand.hbm [shape: bf16[128,256], index: 2, kind: input, shape index: {}]   ;;  %s710_s3 = inlined_call_operand.hbm [shape: bf16[128,256], index: 3, kind: input, shape index: {}]   ;;  %s711_s4 = inlined_call_operand.vmem [shape: f32[1,256], index: 4, kind: input, shape index: {}]   ;;  %s712_s5 = inlined_call_operand.hbm [shape: f32[8,32], index: 5, kind: output, shape index: {}]  }
   0x1   :  { %11 = vsyncpa [#allocation6], 0 }
   0x2   :  { %12 = vsyncpa [#allocation9], 0 }
   0x3   :  { %13 = vsyncpa [#allocation4], 0  ;;  %s606_s18 = smov [#allocation5]   ;;  %s607_s20 = smov [#allocation2]  }
   0x4   :  { %s30_s19 = sshll.u32 %s606_s18, 4  ;;  %s20_s21 = sshll.u32 %s607_s20, 4  ;;  %s31_s19 = int_to_ptr.vmem [resolvable:$true] %s30_s19  ;;  %s21_s21 = int_to_ptr.vmem [resolvable:$true] %s20_s21 }
   0x5   :  { %s488_s24 = scalar_lea.hbm %s708_s1, 128 }
   0x6   :  { %p489_p0 = scmp.ne.s32.totalorder %s708_s1, %s488_s24  ;;  %p492_p1 = scmp.lt.u32.totalorder %s488_s24, %s708_s1 }
   0x8   :  { %p494_p2 = pnand %p492_p1, %p489_p0 }
   0xa   :  { %497 = shalt.err (!%p494_p2)
}
   0xb   :  { %s498_s29 = scalar_lea.vmem %s31_s19, 128  ;;  %p503_p4 = scmp.lt.s32.totalorder %s31_s19, %s31_s19 }
   0xc   :  { %p499_p3 = scmp.ne.s32.totalorder %s31_s19, %s498_s29  ;;  %p504_p5 = scmp.lt.s32.totalorder %s498_s29, %s498_s29 }
   0xe   :  { %p505_p6 = por %p504_p5, %p503_p4 }
  0x10   :  { %p506_p7 = pnand %p505_p6, %p499_p3 }
  0x12   :  { %509 = shalt.err (!%p506_p7)
}
  0x13   :  { %33 = dma.hbm_to_vmem [thread:$0]  %s708_s1, 128, %s31_s19, [#allocation6]  }
  0x14   :  { %s510_s9 = scalar_lea.hbm %s707_s0, 128 }
  0x15   :  { %p511_p8 = scmp.ne.s32.totalorder %s707_s0, %s510_s9  ;;  %p514_p9 = scmp.lt.u32.totalorder %s510_s9, %s707_s0 }
  0x17   :  { %p516_p10 = pnand %p514_p9, %p511_p8 }
  0x19   :  { %519 = shalt.err (!%p516_p10)
}
  0x1a   :  { %s520_s14 = scalar_lea.vmem %s21_s21, 128  ;;  %p525_p12 = scmp.lt.s32.totalorder %s21_s21, %s21_s21 }
  0x1b   :  { %p521_p11 = scmp.ne.s32.totalorder %s21_s21, %s520_s14  ;;  %p526_p13 = scmp.lt.s32.totalorder %s520_s14, %s520_s14 }
  0x1d   :  { %p527_p0 = por %p526_p13, %p525_p12 }
  0x1f   :  { %p528_p1 = pnand %p527_p0, %p521_p11 }
  0x21   :  { %531 = shalt.err (!%p528_p1)
}
  0x22   :  { %23 = dma.hbm_to_vmem [thread:$0]  %s707_s0, 128, %s21_s21, [#allocation3]  }
  0x23   :  { %s608_s16 = smov [#allocation7]   ;;  %s532_s20 = scalar_lea.hbm %s709_s2, 2048 }
  0x24   :  { %s39_s17 = sshll.u32 %s608_s16, 4  ;;  %p533_p2 = scmp.ne.s32.totalorder %s709_s2, %s532_s20  ;;  %s40_s17 = int_to_ptr.vmem [resolvable:$true] %s39_s17 }
  0x25   :  { %p536_p3 = scmp.lt.u32.totalorder %s532_s20, %s709_s2 }
  0x27   :  { %p538_p4 = pnand %p536_p3, %p533_p2 }
  0x29   :  { %541 = shalt.err (!%p538_p4)
}
  0x2a   :  { %s542_s26 = scalar_lea.vmem %s40_s17, 2048  ;;  %p547_p6 = scmp.lt.s32.totalorder %s40_s17, %s40_s17 }
  0x2b   :  { %p543_p5 = scmp.ne.s32.totalorder %s40_s17, %s542_s26  ;;  %p548_p7 = scmp.lt.s32.totalorder %s542_s26, %s542_s26 }
  0x2d   :  { %p549_p8 = por %p548_p7, %p547_p6 }
  0x2f   :  { %p550_p9 = pnand %p549_p8, %p543_p5 }
  0x31   :  { %553 = shalt.err (!%p550_p9)
}
  0x32   :  { %s609_s0 = smov 128   ;;  %s610_s21 = smov 8  }
  0x33   :  { %45 = dma.hbm_to_vmem [thread:$0]  %s709_s2, 2048, %s40_s17, [#allocation6], %s609_s0, %s609_s0, %s610_s21  }
  0x34   :  { %s611_s29 = smov [#allocation8]   ;;  %s554_s8 = scalar_lea.hbm %s710_s3, 2048 }
  0x35   :  { %s51_s30 = sshll.u32 %s611_s29, 4  ;;  %p555_p10 = scmp.ne.s32.totalorder %s710_s3, %s554_s8  ;;  %s52_s30 = int_to_ptr.vmem [resolvable:$true] %s51_s30 }
  0x36   :  { %p558_p11 = scmp.lt.u32.totalorder %s554_s8, %s710_s3 }
  0x38   :  { %p560_p12 = pnand %p558_p11, %p555_p10 }
  0x3a   :  { %563 = shalt.err (!%p560_p12)
}
  0x3b   :  { %s564_s13 = scalar_lea.vmem %s52_s30, 2048  ;;  %p569_p0 = scmp.lt.s32.totalorder %s52_s30, %s52_s30 }
  0x3c   :  { %p565_p13 = scmp.ne.s32.totalorder %s52_s30, %s564_s13  ;;  %p570_p1 = scmp.lt.s32.totalorder %s564_s13, %s564_s13 }
  0x3e   :  { %p571_p2 = por %p570_p1, %p569_p0 }
  0x40   :  { %p572_p3 = pnand %p571_p2, %p565_p13 }
  0x42   :  { %575 = shalt.err (!%p572_p3)
}
  0x43   :  { %57 = dma.hbm_to_vmem [thread:$0]  %s710_s3, 2048, %s52_s30, [#allocation9], %s609_s0, %s609_s0, %s610_s21  }
  0x44   :  { %598 = dma.done.wait [#allocation3], 128  }
  0x45   :  { %599 = vsyncadd [#allocation3], 4294967168 }
  0x46   :  { %600 = dma.done.wait [#allocation6], 2176  }
  0x47   :  { %601 = vsyncadd [#allocation6], 4294965120 }
  0x48   :  { %602 = dma.done.wait [#allocation9], 2048  }
  0x49   :  { %603 = vsyncadd [#allocation9], 4294965248  ;;  %v612_v0 = vmov 0   ;;  %v436_v1 = vld [vmem:[#allocation8 + $0x4] ss:$8 sps:$4 sm:$0xff]   ;;  %v73_v33 = vld [vmem:[#allocation5] sm:$0xff]  ;;  %v232_v37 = vlaneseq }
  0x4a   :  { %203 = vmatprep.mubr.bf16.mxu1 %v612_v0  ;;  %354 = vmatprep.mubr.bf16.mxu0 %v612_v0  ;;  %v438_v2 = vld [vmem:[#allocation7 + $0x4] ss:$8 sps:$4 sm:$0xff]   ;;  %v440_v3 = vld [vmem:[#allocation8] ss:$8 sps:$4 sm:$0xff]   ;;  %v442_v5 = vld [vmem:[#allocation8 + $0x14] ss:$8 sps:$4 sm:$0xff]   ;;  %v74_v35 = vpack.c.bf16 %v73_v33, %v73_v33 }
  0x4b   :  { %171 = vmatprep.subr.bf16.mxu1 %v436_v1  ;;  %v441_v4 = vld [vmem:[#allocation7] ss:$8 sps:$4 sm:$0xff]   ;;  %322 = vmatprep.subr.bf16.mxu0 %v438_v2  ;;  %v444_v6 = vld [vmem:[#allocation7 + $0x14] ss:$8 sps:$4 sm:$0xff]   ;;  %v446_v7 = vld [vmem:[#allocation8 + $0x10] ss:$8 sps:$4 sm:$0xff]  }
  0x4c   :  { %172 = vmatpush1.bf16.msra.mxu1 %v440_v3  ;;  %323 = vmatpush1.bf16.msra.mxu0 %v441_v4  ;;  %v447_v8 = vld [vmem:[#allocation7 + $0x10] ss:$8 sps:$4 sm:$0xff]   ;;  %v448_v9 = vld [vmem:[#allocation8 + $0x24] ss:$8 sps:$4 sm:$0xff]   ;;  %v452_v11 = vld [vmem:[#allocation8 + $0x20] ss:$8 sps:$4 sm:$0xff]  }
  0x4d   :  { %173 = vmatprep.subr.bf16.mxu1 %v442_v5  ;;  %324 = vmatprep.subr.bf16.mxu0 %v444_v6  ;;  %v450_v10 = vld [vmem:[#allocation7 + $0x24] ss:$8 sps:$4 sm:$0xff]   ;;  %v453_v12 = vld [vmem:[#allocation7 + $0x20] ss:$8 sps:$4 sm:$0xff]   ;;  %v454_v13 = vld [vmem:[#allocation8 + $0x34] ss:$8 sps:$4 sm:$0xff]  }
  0x4e   :  { %v456_v14 = vld [vmem:[#allocation7 + $0x34] ss:$8 sps:$4 sm:$0xff]   ;;  %v458_v15 = vld [vmem:[#allocation8 + $0x30] ss:$8 sps:$4 sm:$0xff]   ;;  %v460_v17 = vld [vmem:[#allocation8 + $0x44] ss:$8 sps:$4 sm:$0xff]  }
  0x4f   :  { %v459_v16 = vld [vmem:[#allocation7 + $0x30] ss:$8 sps:$4 sm:$0xff]   ;;  %v462_v18 = vld [vmem:[#allocation7 + $0x44] ss:$8 sps:$4 sm:$0xff]   ;;  %v464_v19 = vld [vmem:[#allocation8 + $0x40] ss:$8 sps:$4 sm:$0xff]  }
  0x50   :  { %174 = vmatpush1.bf16.msra.mxu1 %v446_v7  ;;  %325 = vmatpush1.bf16.msra.mxu0 %v447_v8  ;;  %v465_v20 = vld [vmem:[#allocation7 + $0x40] ss:$8 sps:$4 sm:$0xff]   ;;  %v466_v21 = vld [vmem:[#allocation8 + $0x54] ss:$8 sps:$4 sm:$0xff]   ;;  %v470_v23 = vld [vmem:[#allocation8 + $0x50] ss:$8 sps:$4 sm:$0xff]  }
  0x51   :  { %175 = vmatprep.subr.bf16.mxu1 %v448_v9  ;;  %326 = vmatprep.subr.bf16.mxu0 %v450_v10  ;;  %v468_v22 = vld [vmem:[#allocation7 + $0x54] ss:$8 sps:$4 sm:$0xff]   ;;  %v471_v24 = vld [vmem:[#allocation7 + $0x50] ss:$8 sps:$4 sm:$0xff]   ;;  %v472_v25 = vld [vmem:[#allocation8 + $0x64] ss:$8 sps:$4 sm:$0xff]  }
  0x52   :  { %v474_v26 = vld [vmem:[#allocation7 + $0x64] ss:$8 sps:$4 sm:$0xff]   ;;  %v476_v27 = vld [vmem:[#allocation8 + $0x60] ss:$8 sps:$4 sm:$0xff]   ;;  %v478_v29 = vld [vmem:[#allocation8 + $0x74] ss:$8 sps:$4 sm:$0xff]  }
  0x53   :  { %v477_v28 = vld [vmem:[#allocation7 + $0x60] ss:$8 sps:$4 sm:$0xff]   ;;  %v480_v30 = vld [vmem:[#allocation7 + $0x74] ss:$8 sps:$4 sm:$0xff]   ;;  %v482_v31 = vld [vmem:[#allocation8 + $0x70] ss:$8 sps:$4 sm:$0xff]  }
  0x54   :  { %176 = vmatpush1.bf16.msra.mxu1 %v452_v11  ;;  %327 = vmatpush1.bf16.msra.mxu0 %v453_v12  ;;  %v483_v32 = vld [vmem:[#allocation7 + $0x70] ss:$8 sps:$4 sm:$0xff]   ;;  %v233_v38 = vshrl.u32 %v232_v37, 7  ;;  %vm373_vm0 = vcmask 261120  }
  0x55   :  { %177 = vmatprep.subr.bf16.mxu1 %v454_v13  ;;  %328 = vmatprep.subr.bf16.mxu0 %v456_v14  ;;  %v212_v34 = vld [vmem:[#allocation2] sm:$0xff] }
  0x56   :  { %v213_v36 = vpack.c.bf16 %v212_v34, %v212_v34  ;;  %v234_v39 = vsub.s32 0, %v233_v38  ;;  %v230_v40 = vld [vmem:[%s711_s4] sm:$0x3]  ;;  %v238_v41 = vsub.s32 1, %v233_v38  ;;  %s613_s4 = smov [#allocation10]  }
  0x57   :  { %s381_s15 = sshll.u32 %s613_s4, 4  ;;  %s382_s15 = int_to_ptr.vmem [resolvable:$true] %s381_s15 }
  0x58   :  { %178 = vmatpush1.bf16.msra.mxu1 %v458_v15  ;;  %329 = vmatpush1.bf16.msra.mxu0 %v459_v16  ;;  %v235_v42 = vrot.slane %v230_v40, %v234_v39  ;;  %v239_v43 = vrot.slane %v230_v40, %v238_v41  ;;  %s576_s16 = scalar_lea.vmem %s382_s15, 128  ;;  %p581_p5 = scmp.lt.s32.totalorder %s382_s15, %s382_s15 }
  0x59   :  { %179 = vmatprep.subr.bf16.mxu1 %v460_v17  ;;  %330 = vmatprep.subr.bf16.mxu0 %v462_v18  ;;  %p577_p4 = scmp.ne.s32.totalorder %s382_s15, %s576_s16  ;;  %p582_p6 = scmp.lt.s32.totalorder %s576_s16, %s576_s16 }
  0x5b   :  { %p583_p7 = por %p582_p6, %p581_p5 }
  0x5c   :  { %180 = vmatpush1.bf16.msra.mxu1 %v464_v19  ;;  %331 = vmatpush1.bf16.msra.mxu0 %v465_v20 }
  0x5d   :  { %181 = vmatprep.subr.bf16.mxu1 %v466_v21  ;;  %332 = vmatprep.subr.bf16.mxu0 %v468_v22  ;;  %p584_p8 = pnand %p583_p7, %p577_p4 }
  0x60   :  { %182 = vmatpush1.bf16.msra.mxu1 %v470_v23  ;;  %333 = vmatpush1.bf16.msra.mxu0 %v471_v24 }
  0x61   :  { %183 = vmatprep.subr.bf16.mxu1 %v472_v25  ;;  %334 = vmatprep.subr.bf16.mxu0 %v474_v26 }
  0x64   :  { %184 = vmatpush1.bf16.msra.mxu1 %v476_v27  ;;  %335 = vmatpush1.bf16.msra.mxu0 %v477_v28 }
  0x65   :  { %185 = vmatprep.subr.bf16.mxu1 %v478_v29  ;;  %336 = vmatprep.subr.bf16.mxu0 %v480_v30 }
  0x68   :  { %186 = vmatpush1.bf16.msra.mxu1 %v482_v31  ;;  %337 = vmatpush1.bf16.msra.mxu0 %v483_v32 }
  0x6b   :  { %204 = vmatmul.mubr.bf16.vlgmr.msra.gmra.mrb[0].mxu1 %v74_v35  ;;  %355 = vmatmul.mubr.bf16.vlgmr.msra.gmra.mrb[0].mxu0 %v213_v36 }
 0x13e   :  { %v205_v44 = vpop.f32.mrb[0].mxu1  ;;  %v356_v45 = vpop.f32.mrb[0].mxu0 }
 0x13f   :  { %v424_v46 = vadd.f32 %v235_v42, %v205_v44  ;;  %v207_v47 = vpop.f32.mrb[1].mxu1  ;;  %v358_v48 = vpop.f32.mrb[1].mxu0 }
 0x140   :  { %v426_v49 = vadd.f32 %v239_v43, %v207_v47  ;;  %v209_v50 = vpop.f32.mrb[2].mxu1  ;;  %v360_v51 = vpop.f32.mrb[2].mxu0 }
 0x141   :  { %v425_v52 = vadd.f32 %v424_v46, %v356_v45  ;;  %v210_v53 = vpop.f32.mrb[3].mxu1  ;;  %v361_v54 = vpop.f32.mrb[3].mxu0 }
 0x142   :  { %v427_v55 = vadd.f32 %v426_v49, %v358_v48 }
 0x143   :  { %484 = vtanh.f32 %v425_v52 }
 0x144   :  { %v366_v56 = vmul.f32 0.5, %v427_v55 }
 0x146   :  { %486 = vtanh.f32 %v366_v56 }
 0x14d   :  { %v485_v57 = vpop.eup %484 }
 0x14e   :  { %v370_v61 = vsub.f32 %v485_v57, %v212_v34 }
 0x150   :  { %v487_v58 = vpop.eup %486 }
 0x151   :  { %v368_v59 = vmul.f32 0.5, %v487_v58 }
 0x153   :  { %v369_v60 = vadd.f32 0.5, %v368_v59 }
 0x155   :  { %v371_v62 = vmul.f32 %v370_v61, %v369_v60 }
 0x157   :  { %v372_v63 = vadd.f32 %v371_v62, %v212_v34 }
 0x159   :  { %374 = vst.msk [vmem:[#allocation10] sm:$0xff] %vm373_vm0, %v372_v63 }
 0x15a   :  { %587 = shalt.err (!%p584_p8)
}
 0x15b   :  { %s588_s19 = scalar_lea.hbm %s712_s5, 128 }
 0x15c   :  { %p589_p9 = scmp.ne.s32.totalorder %s712_s5, %s588_s19  ;;  %p592_p10 = scmp.lt.u32.totalorder %s588_s19, %s712_s5 }
 0x15e   :  { %p594_p11 = pnand %p592_p10, %p589_p9 }
 0x160   :  { %597 = shalt.err (!%p594_p11)
}
 0x161   :  { %384 = dma.vmem_to_hbm [thread:$0]  %s382_s15, 128, %s712_s5, [#allocation4]  }
 0x162   :  { %604 = dma.done.wait [#allocation4], 128  }
 0x163   :  { %605 = vsyncadd [#allocation4], 4294967168 }
 0x164   :  { %388 = vsyncpa [#allocation3], 1 }
 0x165   :  { %389 = vsyncpa [#allocation6], 1 }
 0x166   :  { %390 = vsyncpa [#allocation9], 1 }
 0x167   :  { %391 = vsyncpa [#allocation4], 1 }

</bundles_post_ra>
